<compile_context>
chip_gen: v6e
topology: v6e:2x2x1
jax: 0.10.0
libtpu: 0.0.40
codegen_flags: <defaults>
</compile_context>

<pallas_src>
from functools import partial

import jax
import jax.numpy as jnp
from jax.experimental import pallas as pl
from jax.experimental.pallas import tpu as pltpu


def _round_up(x: int, m: int) -> int:
    return (x + m - 1) // m * m


def mlp_kernel(x_ref, w1_ref, b1_ref, w2_ref, b2_ref, o_ref):
    # ---- Layer 1 on the VPU -------------------------------------------------
    # Real contraction depth K (= n_feature) is tiny, so an unrolled outer-product sum of
    # K broadcast FMAs is far cheaper than a 128-deep padded MXU matmul and removes any
    # need to lane-pad x in HBM.  All f32 (v5e VPU has no bf16).
    x = x_ref[...].astype(jnp.float32)            # (TB, K)
    h = b1_ref[...]                               # (1, Hp) -> broadcasts over batch tile
    for k in range(x_ref.shape[1]):               # static unroll; K known at trace time
        h = h + x[:, k:k + 1] * w1_ref[k:k + 1, :]   # (TB,1) * (1,Hp) -> (TB,Hp)
    h = jnp.maximum(h, 0.0)                       # (TB, Hp) f32

    # ---- Layer 2 on the MXU -------------------------------------------------
    # 128-deep contraction, bf16 operands, f32 accumulation, f32 epilogue; padded hidden
    # lanes are zero in both h (zero W1 cols / zero b1) and W2 rows, so they contribute 0.
    out = jnp.dot(h.astype(w2_ref.dtype), w2_ref[...],
                  preferred_element_type=jnp.float32)
    o_ref[...] = (out + b2_ref[...]).astype(o_ref.dtype)


def prepare_params(w1, b1, w2, b2):
    """One-time prep of PyTorch-convention Linear params (done once, NOT per forward call):
       pad hidden/output dims to 128 lanes, transpose to (in, out), cast W2 to bf16."""
    H, K = w1.shape                      # w1: (n_hidden, n_feature)
    N = w2.shape[0]                      # w2: (n_output, n_hidden)
    Hp = _round_up(H, 128)
    Np = _round_up(N, 128)
    f32, bf16 = jnp.float32, jnp.bfloat16
    w1_p = jnp.zeros((K, Hp), f32).at[:, :H].set(w1.T.astype(f32))    # VPU layer-1 rows
    b1_p = jnp.zeros((1, Hp), f32).at[0, :H].set(b1.astype(f32))
    w2_p = jnp.zeros((Hp, Np), bf16).at[:H, :N].set(w2.T.astype(bf16))  # MXU layer-2
    b2_p = jnp.zeros((1, Np), f32).at[0, :N].set(b2.astype(f32))
    return w1_p, b1_p, w2_p, b2_p


@partial(jax.jit, static_argnames=("n_hidden", "n_output", "batch_tile"))
def net_forward(x, w1_p, b1_p, w2_p, b2_p, *, n_hidden, n_output, batch_tile=2048):
    """x: (B, n_feature) f32; padded params from prepare_params. Returns (B, n_output)."""
    B, K = x.shape
    Hp = w1_p.shape[1]
    Np = w2_p.shape[1]

    # Batch tile: multiple of 8 sublanes, capped at `batch_tile`, and small enough that the
    # grid has >= 2 steps once B is non-trivial so v7x megacore can shard the batch tiles.
    TB = min(batch_tile, max(8, _round_up((B + 1) // 2, 8)))
    Bp = _round_up(B, TB)

    # Only x is padded per call (batch rows only, K stays unpadded); fuses under this jit.
    # Padded batch rows compute relu(b1)@W2+b2 != 0 but are sliced off below.
    x_p = x if Bp == B else jnp.pad(x, ((0, Bp - B), (0, 0)))

    grid = (Bp // TB,)

    out_p = pl.pallas_call(
        mlp_kernel,
        out_shape=jax.ShapeDtypeStruct((Bp, Np), jnp.float32),
        grid_spec=pltpu.PrefetchScalarGridSpec(
            num_scalar_prefetch=0,
            grid=grid,
            in_specs=[
                # x tile: streamed per grid step; last dim K equals the full array dim, so
                # it is legal unpadded and the DMA only moves the real K columns.
                pl.BlockSpec((TB, K), lambda i: (i, 0)),
                pl.BlockSpec((K, Hp), lambda i: (0, 0)),   # W1 rows (f32), VMEM-resident
                pl.BlockSpec((1, Hp), lambda i: (0, 0)),   # b1, VMEM-resident
                pl.BlockSpec((Hp, Np), lambda i: (0, 0)),  # W2 (bf16), VMEM-resident
                pl.BlockSpec((1, Np), lambda i: (0, 0)),   # b2, VMEM-resident
            ],
            # Lane-dense (multiple-of-128) output tile -> unmasked vst stores.
            out_specs=pl.BlockSpec((TB, Np), lambda i: (i, 0)),
        ),
        compiler_params=pltpu.CompilerParams(
            dimension_semantics=("parallel",),   # independent batch tiles -> 2 TCs on v7x
        ),
        # Cost estimate from the REAL (unpadded) dims so XLA doesn't overweight this op.
        cost_estimate=pl.CostEstimate(
            flops=2 * B * (K * n_hidden + n_hidden * n_output),
            transcendentals=0,
            bytes_accessed=int(B * K * 4            # x
                               + K * Hp * 4 + Hp * 4    # W1, b1
                               + Hp * Np * 2 + Np * 4   # W2 (bf16), b2
                               + B * n_output * 4),     # output
        ),
    )(x_p, w1_p, b1_p, w2_p, b2_p)

    # Strip batch padding and lane padding; fuses with the rest of this jit.
    return out_p[:B, :n_output].astype(x.dtype)


def init_linear_params(key, in_features, out_features, dtype=jnp.float32):
    # Deterministic init mimicking torch.nn.Linear's U(-1/sqrt(fan_in), 1/sqrt(fan_in)).
    kw, kb = jax.random.split(key)
    bound = 1.0 / (in_features ** 0.5)
    w = jax.random.uniform(kw, (out_features, in_features), dtype, -bound, bound)
    b = jax.random.uniform(kb, (out_features,), dtype, -bound, bound)
    return w, b


if __name__ == "__main__":
    # Tutorial shapes: Net(n_feather=2, n_hidden=10, n_output=2); input is 200 2-D points
    # (two Gaussian clusters of 100 points each, centered at +2 and -2).
    n_feature, n_hidden, n_output = 2, 10, 2

    key = jax.random.PRNGKey(0)
    k_x0, k_x1, k_l1, k_l2 = jax.random.split(key, 4)

    x0 = jax.random.normal(k_x0, (100, n_feature), jnp.float32) + 2.0
    x1 = jax.random.normal(k_x1, (100, n_feature), jnp.float32) - 2.0
    x = jnp.concatenate([x0, x1], axis=0)                       # (200, 2)

    w1, b1 = init_linear_params(k_l1, n_feature, n_hidden)
    w2, b2 = init_linear_params(k_l2, n_hidden, n_output)

    # One-time parameter prep (padding/transpose/cast hoisted out of the forward path).
    w1_p, b1_p, w2_p, b2_p = prepare_params(w1, b1, w2, b2)

    out = net_forward(x, w1_p, b1_p, w2_p, b2_p,
                      n_hidden=n_hidden, n_output=n_output)
    out = jax.block_until_ready(out)
    assert out.shape == (x.shape[0], n_output)

    # Reference matching the kernel's numerics: layer 1 in f32, layer 2 with bf16-cast
    # operands and f32 accumulation.
    hid = jnp.maximum(x @ w1.T + b1, 0.0)
    ref = (hid.astype(jnp.bfloat16).astype(jnp.float32)
           @ w2.astype(jnp.bfloat16).astype(jnp.float32).T + b2)
    assert jnp.allclose(out, ref, atol=2e-3, rtol=2e-3)

    # Sanity vs. full-f32 math (loose tolerance covers the bf16 layer-2 quantization).
    ref_f32 = jnp.maximum(x @ w1.T + b1, 0.0) @ w2.T + b2
    assert jnp.allclose(out, ref_f32, atol=5e-2, rtol=5e-2)

    print("KERNEL_OK")
</pallas_src>

<mosaic_0001>
module attributes {stable_mosaic.version = 11 : i64} {
  func.func @mlp_kernel(%arg0: i32, %arg1: memref<104x2xf32, #tpu.memory_space<vmem>>, %arg2: memref<2x128xf32, #tpu.memory_space<vmem>>, %arg3: memref<1x128xf32, #tpu.memory_space<vmem>>, %arg4: memref<128x128xbf16, #tpu.memory_space<vmem>>, %arg5: memref<1x128xf32, #tpu.memory_space<vmem>>, %arg6: memref<104x128xf32, #tpu.memory_space<vmem>>) attributes {dimension_semantics = [#tpu.dimension_semantics<parallel>], iteration_bounds = array<i64: 2>, scalar_prefetch = 0 : i64, scratch_operands = 0 : i64, tpu.core_type = #tpu.core_type<tc>, window_params = [{transform_indices = @transform_0, window_bounds = array<i64: 104, 2>}, {pipeline_mode = #tpu.pipeline_mode<synchronous>, transform_indices = @transform_1, window_bounds = array<i64: 2, 128>}, {pipeline_mode = #tpu.pipeline_mode<synchronous>, transform_indices = @transform_2, window_bounds = array<i64: 1, 128>}, {pipeline_mode = #tpu.pipeline_mode<synchronous>, transform_indices = @transform_3, window_bounds = array<i64: 128, 128>}, {pipeline_mode = #tpu.pipeline_mode<synchronous>, transform_indices = @transform_4, window_bounds = array<i64: 1, 128>}, {transform_indices = @transform_5, window_bounds = array<i64: 104, 128>}]} {
    %c0 = arith.constant 0 : index
    %c0_0 = arith.constant 0 : index
    %0 = vector.load %arg1[%c0, %c0_0] : memref<104x2xf32, #tpu.memory_space<vmem>>, vector<104x2xf32>
    %c0_1 = arith.constant 0 : index
    %c0_2 = arith.constant 0 : index
    %1 = vector.load %arg3[%c0_1, %c0_2] : memref<1x128xf32, #tpu.memory_space<vmem>>, vector<1x128xf32>
    %2 = vector.extract_strided_slice %0 {offsets = [0, 0], sizes = [104, 1], strides = [1, 1]} : vector<104x2xf32> to vector<104x1xf32>
    %c0_3 = arith.constant 0 : index
    %c0_4 = arith.constant 0 : index
    %3 = vector.load %arg2[%c0_3, %c0_4] : memref<2x128xf32, #tpu.memory_space<vmem>>, vector<1x128xf32>
    %4 = vector.broadcast %2 : vector<104x1xf32> to vector<104x128xf32>
    %5 = vector.broadcast %3 : vector<1x128xf32> to vector<104x128xf32>
    %6 = arith.mulf %4, %5 : vector<104x128xf32>
    %7 = vector.broadcast %1 : vector<1x128xf32> to vector<104x128xf32>
    %8 = arith.addf %7, %6 : vector<104x128xf32>
    %9 = vector.extract_strided_slice %0 {offsets = [0, 1], sizes = [104, 1], strides = [1, 1]} : vector<104x2xf32> to vector<104x1xf32>
    %c1 = arith.constant 1 : index
    %c0_5 = arith.constant 0 : index
    %10 = vector.load %arg2[%c1, %c0_5] : memref<2x128xf32, #tpu.memory_space<vmem>>, vector<1x128xf32>
    %11 = vector.broadcast %9 : vector<104x1xf32> to vector<104x128xf32>
    %12 = vector.broadcast %10 : vector<1x128xf32> to vector<104x128xf32>
    %13 = arith.mulf %11, %12 : vector<104x128xf32>
    %14 = arith.addf %8, %13 : vector<104x128xf32>
    %cst = arith.constant 0.000000e+00 : f32
    %15 = vector.broadcast %cst : f32 to vector<104x128xf32>
    %16 = arith.maximumf %14, %15 : vector<104x128xf32>
    %17 = arith.truncf %16 : vector<104x128xf32> to vector<104x128xbf16>
    %c0_6 = arith.constant 0 : index
    %c0_7 = arith.constant 0 : index
    %18 = vector.load %arg4[%c0_6, %c0_7] : memref<128x128xbf16, #tpu.memory_space<vmem>>, vector<128x128xbf16>
    %cst_8 = arith.constant dense<0.000000e+00> : vector<104x128xf32>
    %19 = tpu.matmul %17, %18, %cst_8 {dimension_numbers = #tpu.dot_dimension_numbers<[1], [0], [0], [1], [0, 0, 1, 1], [], []>} : vector<104x128xbf16>, vector<128x128xbf16>, vector<104x128xf32> -> vector<104x128xf32>
    %c0_9 = arith.constant 0 : index
    %c0_10 = arith.constant 0 : index
    %20 = vector.load %arg5[%c0_9, %c0_10] : memref<1x128xf32, #tpu.memory_space<vmem>>, vector<1x128xf32>
    %21 = vector.broadcast %20 : vector<1x128xf32> to vector<104x128xf32>
    %22 = arith.addf %19, %21 : vector<104x128xf32>
    %c0_11 = arith.constant 0 : index
    %c0_12 = arith.constant 0 : index
    %23 = vector.load %arg6[%c0_11, %c0_12] : memref<104x128xf32, #tpu.memory_space<vmem>>, vector<104x128xf32>
    tpu.vector_store %arg6[%c0_11, %c0_12], %22 {strides = array<i32>} : memref<104x128xf32, #tpu.memory_space<vmem>>, vector<104x128xf32>,
    return
  }
  func.func @transform_0(%arg0: i32) -> (i32, i32) {
    %c0_i32 = arith.constant 0 : i32
    %c0_i32_0 = arith.constant 0 : i32
    return %arg0, %c0_i32 : i32, i32
  }
  func.func @transform_1(%arg0: i32) -> (i32, i32) {
    %c0_i32 = arith.constant 0 : i32
    %c0_i32_0 = arith.constant 0 : i32
    %c0_i32_1 = arith.constant 0 : i32
    return %c0_i32, %c0_i32_0 : i32, i32
  }
  func.func @transform_2(%arg0: i32) -> (i32, i32) {
    %c0_i32 = arith.constant 0 : i32
    %c0_i32_0 = arith.constant 0 : i32
    %c0_i32_1 = arith.constant 0 : i32
    return %c0_i32, %c0_i32_0 : i32, i32
  }
  func.func @transform_3(%arg0: i32) -> (i32, i32) {
    %c0_i32 = arith.constant 0 : i32
    %c0_i32_0 = arith.constant 0 : i32
    %c0_i32_1 = arith.constant 0 : i32
    return %c0_i32, %c0_i32_0 : i32, i32
  }
  func.func @transform_4(%arg0: i32) -> (i32, i32) {
    %c0_i32 = arith.constant 0 : i32
    %c0_i32_0 = arith.constant 0 : i32
    %c0_i32_1 = arith.constant 0 : i32
    return %c0_i32, %c0_i32_0 : i32, i32
  }
  func.func @transform_5(%arg0: i32) -> (i32, i32) {
    %c0_i32 = arith.constant 0 : i32
    %c0_i32_0 = arith.constant 0 : i32
    return %arg0, %c0_i32 : i32, i32
  }
}

</mosaic_0001>

<bundles_post_ra>
// kernel: net_forward.1
= control target key start
LH: loop header
LB: loop body
LE: loop exit
PB: predicated region body
PF: predicated region fallthrough
CT: control target
= control target key end

     0   :  { %s845_s18 = smov 0   ;;  %s1021_s0 = inlined_call_operand.vmem [shape: f32[208,2], index: 0, kind: input, shape index: {}]   ;;  %s1022_s1 = inlined_call_operand.vmem [shape: f32[2,128], index: 1, kind: input, shape index: {}]   ;;  %s1023_s2 = inlined_call_operand.vmem [shape: f32[1,128], index: 2, kind: input, shape index: {}]   ;;  %s1024_s3 = inlined_call_operand.vmem [shape: bf16[128,128], index: 3, kind: input, shape index: {}]   ;;  %s1025_s4 = inlined_call_operand.vmem [shape: f32[1,128], index: 4, kind: input, shape index: {}]   ;;  %s1026_s5 = inlined_call_operand.vmem [shape: f32[208,128], index: 5, kind: output, shape index: {}]  }
   0x1 LB: > { %s676_s19 = sadd.s32 4294967295, %s809_s18   ;;  %p680_p0 = scmp.ge.s32.totalorder %s809_s18, 1  ;;  %s809_s18 = sphi %s845_s18, %s15_s18  }
   0x2   : > { %p188_p1 = scmp.lt.s32.totalorder %s809_s18, 3 }
   0x4   : > { %p189_p2 = pnand %p680_p0, %p188_p1 }
   0x5   : > { %s216_s20 = smul.u32 (!%p189_p2), 13, %s676_s19 }
   0x6   : > { %192 = sbr.rel (%p189_p2) target bundleno = 411 (0x19b), region = 40 }
   0x7   : > { %p217_p3 = scmp.lt.s32.totalorder (!%p189_p2), %s216_s20, 25 }
   0xb   : > { %v811_v0 = vmov 1   ;;  %v812_v1 = vmov 0   ;;  %v795_v2 = vld [vmem:[%s1024_s3 + $0x38] sm:$0xff]   ;;  %v813_v3 = vmov 0.0   ;;  %v796_v4 = vld [vmem:[%s1024_s3 + $0x30] sm:$0xff]   ;;  %s1028_s20 = smov (!%p217_p3, %s216_s20), 25 }
   0xc   : > { %785 = vset.pattern.permute.xlu1 %v811_v0  ;;  %784 = vset.pattern.permute.xlu0 %v812_v1  ;;  %s681_s25 = sshll.u32 %s1028_s20, 3  ;;  %v797_v5 = vld [vmem:[%s1024_s3 + $0x28] sm:$0xff]   ;;  %v798_v8 = vld [vmem:[%s1024_s3 + $0x20] sm:$0xff]   ;;  %v799_v11 = vld [vmem:[%s1024_s3 + $0x18] sm:$0xff]   ;;  %vm814_vm0 = vmmov 0  }
   0xd   : > { %712 = vmatprep.subr.bf16.mxu0 %v813_v3  ;;  %756 = vmatprep.subr.bf16.mxu1 %v813_v3  ;;  %s876_s30 = scalar_lea.vmem %s1021_s0, %s681_s25  ;;  %v800_v14 = vld [vmem:[%s1024_s3 + $0x10] sm:$0xff]   ;;  %v801_v15 = vld [vmem:[%s1024_s3 + $0x8] sm:$0xff]   ;;  %v802_v16 = vld [vmem:[%s1024_s3] sm:$0xff]   ;;  %s1003_s29 = scalar_lea.vmem %s1026_s5, %s681_s25 }
   0xe   : > { %713 = vmatpush3.bf16.msra.mxu0 %v795_v2  ;;  %764 = vmatpush3.bf16.msra.mxu1 %v795_v2  ;;  %v229_v6 = vld [vmem:[%s876_s30] sm:$0xff]  ;;  %v230_v7 = vld [vmem:[%s876_s30 + $0x8] sm:$0xff]  ;;  %v231_v9 = vld [vmem:[%s876_s30 + $0x10] sm:$0xff] }
   0xf   : > { %714 = vmatprep.subr.bf16.mxu0 %v813_v3  ;;  %757 = vmatprep.subr.bf16.mxu1 %v813_v3  ;;  %v232_v10 = vld [vmem:[%s876_s30 + $0x18] sm:$0xff]  ;;  %v237_v12 = vld [vmem:[%s876_s30 + $0x40] sm:$0xff]  ;;  %v238_v13 = vld [vmem:[%s876_s30 + $0x48] sm:$0xff] }
  0x10   : > { %347 = vperm.xlu1 %785, %v229_v6   ;;  %246 = vperm.xlu0 %784, %v229_v6   ;;  %v233_v17 = vld [vmem:[%s876_s30 + $0x20] sm:$0xff]  ;;  %v240_v18 = vld [vmem:[%s876_s30 + $0x58] sm:$0xff]  ;;  %v239_v19 = vld [vmem:[%s876_s30 + $0x50] sm:$0xff] }
  0x11   : > { %728 = vmatprep.mubr.msk.bf16.mxu0 %vm814_vm0, %v813_v3  ;;  %744 = vmatprep.mubr.msk.bf16.mxu1 %vm814_vm0, %v813_v3  ;;  %v234_v20 = vld [vmem:[%s876_s30 + $0x28] sm:$0xff]  ;;  %v236_v21 = vld [vmem:[%s876_s30 + $0x38] sm:$0xff]  ;;  %v235_v22 = vld [vmem:[%s876_s30 + $0x30] sm:$0xff] }
  0x12   : > { %715 = vmatpush3.bf16.msra.mxu0 %v796_v4  ;;  %765 = vmatpush3.bf16.msra.mxu1 %v796_v4  ;;  %v241_v23 = vld [vmem:[%s876_s30 + $0x60] sm:$0xff] }
  0x13   : > { %716 = vmatprep.subr.bf16.mxu0 %v813_v3  ;;  %758 = vmatprep.subr.bf16.mxu1 %v813_v3  ;;  %v934_v24 = vld [vmem:[%s1022_s1] ss:$0 sm:$0xff]  ;;  %v945_v29 = vld [vmem:[%s1022_s1 + $0x1] ss:$0 sm:$0xff] }
  0x14   : > { %351 = vperm.xlu1 %785, %v230_v7   ;;  %251 = vperm.xlu0 %784, %v230_v7   ;;  %v939_v26 = vld [vmem:[%s1023_s2] ss:$0 sm:$0xff] }
  0x16   : > { %717 = vmatpush3.bf16.msra.mxu0 %v797_v5  ;;  %766 = vmatpush3.bf16.msra.mxu1 %v797_v5 }
  0x17   : > { %718 = vmatprep.subr.bf16.mxu0 %v813_v3  ;;  %759 = vmatprep.subr.bf16.mxu1 %v813_v3 }
  0x18   : > { %786 = vset.pattern.permute.xlu1 %v812_v1  ;;  %256 = vperm.xlu0 %784, %v231_v9  }
  0x19   : > { %261 = vperm.xlu1 %786, %v232_v10  }
  0x1a   : > { %719 = vmatpush3.bf16.msra.mxu0 %v798_v8  ;;  %767 = vmatpush3.bf16.msra.mxu1 %v798_v8 }
  0x1b   : > { %720 = vmatprep.subr.bf16.mxu0 %v813_v3  ;;  %760 = vmatprep.subr.bf16.mxu1 %v813_v3 }
  0x1c   : > { %286 = vperm.xlu0 %784, %v237_v12  }
  0x1d   : > { %291 = vperm.xlu1 %786, %v238_v13  }
  0x1e   : > { %721 = vmatpush3.bf16.msra.mxu0 %v799_v11  ;;  %768 = vmatpush3.bf16.msra.mxu1 %v799_v11 }
  0x1f   : > { %722 = vmatprep.subr.bf16.mxu0 %v813_v3  ;;  %761 = vmatprep.subr.bf16.mxu1 %v813_v3 }
  0x20   : > { %787 = vset.pattern.permute.xlu0 %v811_v0 }
  0x21   : > { %788 = vset.pattern.permute.xlu1 %v811_v0  ;;  %355 = vperm.xlu0 %787, %v231_v9  }
  0x22   : > { %723 = vmatpush3.bf16.msra.mxu0 %v800_v14  ;;  %769 = vmatpush3.bf16.msra.mxu1 %v800_v14 }
  0x23   : > { %724 = vmatprep.subr.bf16.mxu0 %v813_v3  ;;  %762 = vmatprep.subr.bf16.mxu1 %v813_v3 }
  0x24   : > { %359 = vperm.xlu1 %788, %v232_v10  }
  0x25   : > { %383 = vperm.xlu0 %787, %v238_v13  }
  0x26   : > { %725 = vmatpush3.bf16.msra.mxu0 %v801_v15  ;;  %770 = vmatpush3.bf16.msra.mxu1 %v801_v15 }
  0x27   : > { %726 = vmatprep.subr.bf16.mxu0 %v813_v3  ;;  %763 = vmatprep.subr.bf16.mxu1 %v813_v3 }
  0x28   : > { %379 = vperm.xlu1 %788, %v237_v12  }
  0x29   : > { %363 = vperm.xlu0 %787, %v233_v17  }
  0x2a   : > { %727 = vmatpush3.bf16.msra.mxu0 %v802_v16  ;;  %771 = vmatpush3.bf16.msra.mxu1 %v802_v16 }
  0x2c   : > { %789 = vset.pattern.permute.xlu1 %v812_v1 }
  0x2d   : > { %266 = vperm.xlu1 %789, %v233_v17   ;;  %391 = vperm.xlu0 %787, %v240_v18  }
  0x31   : > { %296 = vperm.xlu1 %789, %v239_v19   ;;  %791 = vset.pattern.permute.xlu0 %v812_v1 }
  0x32   : > { %271 = vperm.xlu0 %791, %v234_v20  }
  0x35   : > { %301 = vperm.xlu1 %789, %v240_v18  }
  0x36   : > { %281 = vperm.xlu0 %791, %v236_v21  }
  0x39   : > { %790 = vset.pattern.permute.xlu1 %v811_v0 }
  0x3a   : > { %367 = vperm.xlu1 %790, %v234_v20   ;;  %794 = vset.pattern.permute.xlu0 %v811_v0 }
  0x3b   : > { %375 = vperm.xlu0 %794, %v236_v21  }
  0x3e   : > { %387 = vperm.xlu1 %790, %v239_v19  }
  0x42   : > { %792 = vset.pattern.permute.xlu1 %v812_v1 }
  0x43   : > { %276 = vperm.xlu1 %792, %v235_v22  }
  0x47   : > { %306 = vperm.xlu1 %792, %v241_v23  }
  0x4b   : > { %793 = vset.pattern.permute.xlu1 %v811_v0 }
  0x4c   : > { %371 = vperm.xlu1 %793, %v235_v22  }
  0x50   : > { %395 = vperm.xlu1 %793, %v241_v23  }
  0x8b   : > { %v348_v25 = vpop.permute.xlu1 %347  ;;  %v247_v27 = vpop.permute.xlu0 %246 }
  0x8c   : > { %v313_v28 = vmul.f32 %v934_v24, %v247_v27  ;;  %v402_v33 = vmul.f32 %v945_v29, %v348_v25 }
  0x8e   : > { %v332_v30 = vadd.f32 %v939_v26, %v313_v28 }
  0x8f   : > { %v352_v31 = vpop.permute.xlu1 %351  ;;  %v252_v32 = vpop.permute.xlu0 %251 }
  0x90   : > { %v314_v34 = vmul.f32 %v934_v24, %v252_v32  ;;  %v415_v35 = vadd.f32 %v402_v33, %v332_v30  ;;  %v403_v36 = vmul.f32 %v945_v29, %v352_v31 }
  0x92   : > { %v333_v37 = vadd.f32 %v939_v26, %v314_v34  ;;  %v428_v41 = vmax.f32 %v415_v35, 0.0 }
  0x93   : > { %v257_v38 = vpop.permute.xlu0 %256 }
  0x94   : > { %v416_v39 = vadd.f32 %v403_v36, %v333_v37  ;;  %v262_v40 = vpop.permute.xlu1 %261  ;;  %v315_v43 = vmul.f32 %v934_v24, %v257_v38 }
  0x95   : > { %v316_v47 = vmul.f32 %v934_v24, %v262_v40 }
  0x96   : > { %v429_v42 = vmax.f32 %v416_v39, 0.0  ;;  %v334_v48 = vadd.f32 %v939_v26, %v315_v43 }
  0x97   : > { %v287_v44 = vpop.permute.xlu0 %286  ;;  %v335_v53 = vadd.f32 %v939_v26, %v316_v47 }
  0x98   : > { %v292_v45 = vpop.permute.xlu1 %291  ;;  %v441_v46 = vpack.c.bf16 %v429_v42, %v428_v41  ;;  %v321_v54 = vmul.f32 %v934_v24, %v287_v44 }
  0x99   : > { %v322_v50 = vmul.f32 %v934_v24, %v292_v45 }
  0x9a   : > { %729 = vmatmul.mubr.bf16.vlgmr.msra.gmra.mxu0 %v441_v46  ;;  %v340_v63 = vadd.f32 %v939_v26, %v321_v54 }
  0x9b   : > { %732 = vmatprep.mubr.msk.bf16.mxu0 %vm814_vm0, %v813_v3  ;;  %v341_v59 = vadd.f32 %v939_v26, %v322_v50 }
  0x9c   : > { %v356_v49 = vpop.permute.xlu0 %355 }
  0x9d   : > { %v404_v51 = vmul.f32 %v945_v29, %v356_v49 }
  0x9f   : > { %v360_v52 = vpop.permute.xlu1 %359  ;;  %v417_v56 = vadd.f32 %v404_v51, %v334_v48 }
  0xa0   : > { %v405_v55 = vmul.f32 %v945_v29, %v360_v52  ;;  %v384_v58 = vpop.permute.xlu0 %383 }
  0xa1   : > { %v430_v60 = vmax.f32 %v417_v56, 0.0  ;;  %v411_v61 = vmul.f32 %v945_v29, %v384_v58 }
  0xa2   : > { %v418_v57 = vadd.f32 %v405_v55, %v335_v53 }
  0xa3   : > { %v380_v62 = vpop.permute.xlu1 %379  ;;  %v424_v2 = vadd.f32 %v411_v61, %v341_v59 }
  0xa4   : > { %v431_v0 = vmax.f32 %v418_v57, 0.0  ;;  %v410_v1 = vmul.f32 %v945_v29, %v380_v62  ;;  %v364_v6 = vpop.permute.xlu0 %363 }
  0xa5   : > { %v437_v7 = vmax.f32 %v424_v2, 0.0  ;;  %v406_v18 = vmul.f32 %v945_v29, %v364_v6 }
  0xa6   : > { %v423_v4 = vadd.f32 %v410_v1, %v340_v63  ;;  %v442_v5 = vpack.c.bf16 %v431_v0, %v430_v60 }
  0xa8   : > { %v436_v8 = vmax.f32 %v423_v4, 0.0  ;;  %v267_v9 = vpop.permute.xlu1 %266  ;;  %733 = vmatmul.mubr.bf16.gmra.mxu0 %v442_v5  ;;  %v392_v11 = vpop.permute.xlu0 %391 }
  0xa9   : > { %736 = vmatprep.mubr.msk.bf16.mxu0 %vm814_vm0, %v813_v3  ;;  %v317_v13 = vmul.f32 %v934_v24, %v267_v9  ;;  %v413_v28 = vmul.f32 %v945_v29, %v392_v11 }
  0xaa   : > { %v445_v10 = vpack.c.bf16 %v437_v7, %v436_v8 }
  0xab   : > { %v336_v17 = vadd.f32 %v939_v26, %v317_v13 }
  0xac   : > { %v297_v12 = vpop.permute.xlu1 %296  ;;  %745 = vmatmul.mubr.bf16.vlgmr.msra.gmra.mxu1 %v445_v10 }
  0xad   : > { %748 = vmatprep.mubr.msk.bf16.mxu1 %vm814_vm0, %v813_v3  ;;  %v272_v14 = vpop.permute.xlu0 %271  ;;  %v419_v21 = vadd.f32 %v406_v18, %v336_v17  ;;  %v323_v23 = vmul.f32 %v934_v24, %v297_v12 }
  0xae   : > { %v318_v16 = vmul.f32 %v934_v24, %v272_v14 }
  0xaf   : > { %v432_v31 = vmax.f32 %v419_v21, 0.0  ;;  %v342_v33 = vadd.f32 %v939_v26, %v323_v23 }
  0xb0   : > { %v302_v15 = vpop.permute.xlu1 %301  ;;  %v337_v20 = vadd.f32 %v939_v26, %v318_v16 }
  0xb1   : > { %v324_v19 = vmul.f32 %v934_v24, %v302_v15  ;;  %v282_v37 = vpop.permute.xlu0 %281 }
  0xb2   : > { %v320_v43 = vmul.f32 %v934_v24, %v282_v37 }
  0xb3   : > { %v343_v25 = vadd.f32 %v939_v26, %v324_v19 }
  0xb4   : > { %v339_v48 = vadd.f32 %v939_v26, %v320_v43 }
  0xb5   : > { %v368_v22 = vpop.permute.xlu1 %367  ;;  %v426_v34 = vadd.f32 %v413_v28, %v343_v25 }
  0xb6   : > { %v407_v27 = vmul.f32 %v945_v29, %v368_v22  ;;  %v376_v45 = vpop.permute.xlu0 %375 }
  0xb7   : > { %v439_v40 = vmax.f32 %v426_v34, 0.0  ;;  %v409_v49 = vmul.f32 %v945_v29, %v376_v45 }
  0xb8   : > { %v420_v30 = vadd.f32 %v407_v27, %v337_v20 }
  0xb9   : > { %v388_v32 = vpop.permute.xlu1 %387  ;;  %v422_v53 = vadd.f32 %v409_v49, %v339_v48 }
  0xba   : > { %v433_v35 = vmax.f32 %v420_v30, 0.0  ;;  %v412_v36 = vmul.f32 %v945_v29, %v388_v32 }
  0xbc   : > { %v425_v38 = vadd.f32 %v412_v36, %v342_v33  ;;  %v443_v39 = vpack.c.bf16 %v433_v35, %v432_v31 }
  0xbe   : > { %v438_v41 = vmax.f32 %v425_v38, 0.0  ;;  %v277_v42 = vpop.permute.xlu1 %276  ;;  %737 = vmatmul.mubr.bf16.gmra.mxu0 %v443_v39 }
  0xbf   : > { %740 = vmatprep.mubr.msk.bf16.mxu0 %vm814_vm0, %v813_v3  ;;  %v319_v47 = vmul.f32 %v934_v24, %v277_v42 }
  0xc0   : > { %v446_v44 = vpack.c.bf16 %v439_v40, %v438_v41 }
  0xc1   : > { %v338_v51 = vadd.f32 %v939_v26, %v319_v47 }
  0xc2   : > { %v307_v46 = vpop.permute.xlu1 %306  ;;  %749 = vmatmul.mubr.bf16.gmra.mxu1 %v446_v44 }
  0xc3   : > { %752 = vmatprep.mubr.msk.bf16.mxu1 %vm814_vm0, %v813_v3  ;;  %v325_v52 = vmul.f32 %v934_v24, %v307_v46  ;;  %v435_v3 = vmax.f32 %v422_v53, 0.0  ;;  %v686_v24 = vld [vmem:[%s1025_s4] ss:$0 sm:$0xff] }
  0xc5   : > { %v344_v57 = vadd.f32 %v939_v26, %v325_v52 }
  0xc7   : > { %v372_v50 = vpop.permute.xlu1 %371 }
  0xc8   : > { %v408_v54 = vmul.f32 %v945_v29, %v372_v50 }
  0xca   : > { %v421_v55 = vadd.f32 %v408_v54, %v338_v51 }
  0xcb   : > { %v396_v56 = vpop.permute.xlu1 %395 }
  0xcc   : > { %v434_v58 = vmax.f32 %v421_v55, 0.0  ;;  %v414_v59 = vmul.f32 %v945_v29, %v396_v56 }
  0xce   : > { %v427_v60 = vadd.f32 %v414_v59, %v344_v57  ;;  %v444_v61 = vpack.c.bf16 %v435_v3, %v434_v58 }
  0xd0   : > { %v440_v62 = vmax.f32 %v427_v60, 0.0  ;;  %741 = vmatmul.mubr.bf16.gmra.mxu0 %v444_v61 }
  0xd2   : > { %v447_v63 = vpack.c.bf16 %v440_v62, %v440_v62 }
  0xd4   : > { %753 = vmatmul.mubr.bf16.gmra.mxu1 %v447_v63 }
 0x15a   : > { %v553_v26 = vpop.f32.mrf.mxu0 }
 0x15b   : > { %v554_v29 = vadd.f32 %v686_v24, %v553_v26 }
 0x15c   : > { %v730_v0 = vpop.f32.mrf.mxu0 }
 0x15d   : > { %607 = vst [vmem:[%s1003_s29] sm:$0xff] %v554_v29 }
 0x15e   : > { %v556_v1 = vpop.f32.mrf.mxu0 }
 0x15f   : > { %v557_v2 = vadd.f32 %v686_v24, %v556_v1 }
 0x160   : > { %v731_v4 = vpop.f32.mrf.mxu0 }
 0x161   : > { %608 = vst [vmem:[%s1003_s29 + $0x8] sm:$0xff] %v557_v2 }
 0x168   : > { %v561_v5 = vpop.f32.mrf.mxu0 }
 0x169   : > { %v562_v6 = vadd.f32 %v686_v24, %v561_v5 }
 0x16a   : > { %v734_v7 = vpop.f32.mrf.mxu0 }
 0x16b   : > { %609 = vst [vmem:[%s1003_s29 + $0x10] sm:$0xff] %v562_v6 }
 0x16c   : > { %v564_v8 = vpop.f32.mrf.mxu0  ;;  %v585_v9 = vpop.f32.mrf.mxu1 }
 0x16d   : > { %v565_v10 = vadd.f32 %v686_v24, %v564_v8  ;;  %v586_v11 = vadd.f32 %v686_v24, %v585_v9 }
 0x16e   : > { %v735_v12 = vpop.f32.mrf.mxu0  ;;  %v746_v13 = vpop.f32.mrf.mxu1 }
 0x16f   : > { %610 = vst [vmem:[%s1003_s29 + $0x18] sm:$0xff] %v565_v10  ;;  %615 = vst [vmem:[%s1003_s29 + $0x40] sm:$0xff] %v586_v11 }
 0x170   : > { %v588_v14 = vpop.f32.mrf.mxu1 }
 0x171   : > { %v589_v15 = vadd.f32 %v686_v24, %v588_v14 }
 0x172   : > { %v747_v16 = vpop.f32.mrf.mxu1 }
 0x173   : > { %616 = vst [vmem:[%s1003_s29 + $0x48] sm:$0xff] %v589_v15 }
 0x17e   : > { %v569_v17 = vpop.f32.mrf.mxu0 }
 0x17f   : > { %v570_v18 = vadd.f32 %v686_v24, %v569_v17 }
 0x180   : > { %v738_v19 = vpop.f32.mrf.mxu0 }
 0x181   : > { %611 = vst [vmem:[%s1003_s29 + $0x20] sm:$0xff] %v570_v18 }
 0x182   : > { %v572_v20 = vpop.f32.mrf.mxu0  ;;  %v593_v21 = vpop.f32.mrf.mxu1 }
 0x183   : > { %v573_v22 = vadd.f32 %v686_v24, %v572_v20  ;;  %v594_v23 = vadd.f32 %v686_v24, %v593_v21 }
 0x184   : > { %v739_v25 = vpop.f32.mrf.mxu0  ;;  %v750_v27 = vpop.f32.mrf.mxu1 }
 0x185   : > { %612 = vst [vmem:[%s1003_s29 + $0x28] sm:$0xff] %v573_v22  ;;  %617 = vst [vmem:[%s1003_s29 + $0x50] sm:$0xff] %v594_v23 }
 0x186   : > { %v596_v28 = vpop.f32.mrf.mxu1 }
 0x187   : > { %v597_v30 = vadd.f32 %v686_v24, %v596_v28 }
 0x188   : > { %v751_v31 = vpop.f32.mrf.mxu1 }
 0x189   : > { %618 = vst [vmem:[%s1003_s29 + $0x58] sm:$0xff] %v597_v30 }
 0x190   : > { %v577_v32 = vpop.f32.mrf.mxu0 }
 0x191   : > { %v578_v33 = vadd.f32 %v686_v24, %v577_v32 }
 0x192   : > { %v742_v34 = vpop.f32.mrf.mxu0 }
 0x193   : > { %613 = vst [vmem:[%s1003_s29 + $0x30] sm:$0xff] %v578_v33 }
 0x194   : > { %v580_v35 = vpop.f32.mrf.mxu0  ;;  %v601_v36 = vpop.f32.mrf.mxu1 }
 0x195   : > { %v581_v37 = vadd.f32 %v686_v24, %v580_v35  ;;  %v602_v38 = vadd.f32 %v686_v24, %v601_v36 }
 0x196   : > { %v743_v39 = vpop.f32.mrf.mxu0  ;;  %v754_v40 = vpop.f32.mrf.mxu1 }
 0x197   : > { %614 = vst [vmem:[%s1003_s29 + $0x38] sm:$0xff] %v581_v37  ;;  %619 = vst [vmem:[%s1003_s29 + $0x60] sm:$0xff] %v602_v38 }
 0x198   : > { %v604_v41 = vpop.f32.mrf.mxu1 }
 0x19a   : > { %v755_v42 = vpop.f32.mrf.mxu1 }
 0x19b PF: > { %s15_s18 = sadd.s32 1, %s809_s18  }
 0x19c   : > { %p12_p4 = scmp.ge.s32.totalorder %s15_s18, 4  }
 0x19e   :  { %14 = sbr.rel (!%p12_p4) target bundleno = 1 (0x1), region = 70 }

</bundles_post_ra>
